<compile_context>
chip_gen: v6e
topology: v6e:2x2x1
jax: 0.10.0
libtpu: 0.0.40
codegen_flags: <defaults>
</compile_context>

<pallas_src>
import jax
import jax.numpy as jnp
import numpy as np
from jax.experimental import pallas as pl
from jax.experimental.pallas import tpu as pltpu


def _make_dma_copy_kernel(row_splits):
    """Build a kernel that DMA-copies (rows, DE) slabs HBM -> HBM.

    row_splits: static tuple of (row_start, row_count) pairs covering [0, N).
    """

    def kernel(x_hbm, o_hbm, sems):
        # x_hbm: (N, DE) ref in HBM ; o_hbm: (1, N, DE) ref in HBM
        # Start every chunk copy first so the DMA engines overlap, then wait.
        copies = []
        for i, (r0, rows) in enumerate(row_splits):
            cp = pltpu.make_async_copy(
                x_hbm.at[pl.ds(r0, rows), :],
                o_hbm.at[0, pl.ds(r0, rows), :],
                sems.at[i],
            )
            cp.start()
            copies.append(cp)
        for cp in copies:
            cp.wait()

    return kernel


def reshape_to_flat(
    x: jax.Array,
    num_chunks: int | None = None,
    target_chunk_bytes: int = 16 << 20,  # ~16 MiB per DMA chunk
) -> jax.Array:
    """Pallas implementation of ReshapeToFlat: (N, D, E) -> (1, N, D*E)."""
    n, d, e = x.shape
    de = d * e
    itemsize = jnp.dtype(x.dtype).itemsize

    # Free, metadata-only flatten of the trailing dims (row-major contiguous).
    x_flat = x.reshape(n, de)

    if n == 0 or de == 0:
        # Degenerate: nothing to copy.
        return x.reshape(1, n, de)

    total_bytes = n * de * itemsize
    if num_chunks is None:
        num_chunks = max(1, min(8, -(-total_bytes // target_chunk_bytes)))
    num_chunks = int(max(1, min(num_chunks, n)))

    # Static, near-even split of the N rows across the chunks.
    base, rem = divmod(n, num_chunks)
    row_splits = []
    start = 0
    for i in range(num_chunks):
        rows = base + (1 if i < rem else 0)
        row_splits.append((start, rows))
        start += rows
    row_splits = tuple(row_splits)

    kernel = _make_dma_copy_kernel(row_splits)

    return pl.pallas_call(
        kernel,
        out_shape=jax.ShapeDtypeStruct((1, n, de), x.dtype),
        in_specs=[pl.BlockSpec(memory_space=pl.ANY)],
        out_specs=pl.BlockSpec(memory_space=pl.ANY),
        scratch_shapes=[pltpu.SemaphoreType.DMA((num_chunks,))],
        cost_estimate=pl.CostEstimate(
            flops=0,
            transcendentals=0,
            bytes_accessed=2 * total_bytes,
        ),
    )(x_flat)


if __name__ == "__main__":
    key = jax.random.PRNGKey(0)

    # 1) Default path (single DMA chunk for this tiny input), f32.
    N, D, E = 16, 16, 32
    x = jax.random.normal(key, (N, D, E), dtype=jnp.float32)
    ref = jnp.reshape(x, (1, N, D * E))
    out = jax.block_until_ready(reshape_to_flat(x))
    assert out.shape == (1, N, D * E), out.shape
    assert out.dtype == x.dtype
    np.testing.assert_array_equal(np.asarray(out), np.asarray(ref))

    # 2) Explicit multi-chunk path (several concurrent DMAs).
    out_chunked = jax.block_until_ready(reshape_to_flat(x, num_chunks=4))
    np.testing.assert_array_equal(np.asarray(out_chunked), np.asarray(ref))

    # 3) Non-multiple-of-8 N and bf16 dtype: DMAs handle ragged rows natively.
    N2, D2, E2 = 10, 4, 64
    x2 = jax.random.normal(key, (N2, D2, E2), dtype=jnp.float32).astype(jnp.bfloat16)
    ref2 = jnp.reshape(x2, (1, N2, D2 * E2))
    out2 = jax.block_until_ready(reshape_to_flat(x2, num_chunks=3))
    assert out2.shape == (1, N2, D2 * E2) and out2.dtype == x2.dtype
    np.testing.assert_array_equal(np.asarray(out2), np.asarray(ref2))

    print("KERNEL_OK")
</pallas_src>

<mosaic_0001>
module attributes {stable_mosaic.version = 11 : i64} {
  func.func @kernel(%arg0: memref<16x512xf32, #tpu.memory_space<any>>, %arg1: memref<1x16x512xf32, #tpu.memory_space<any>>, %arg2: memref<1x!tpu.dma_semaphore, #tpu.memory_space<semaphore_mem>>) attributes {dimension_semantics = [], scalar_prefetch = 0 : i64, scratch_operands = 1 : i64, tpu.core_type = #tpu.core_type<tc>} {
    %c0_i32 = arith.constant 0 : i32
    %c0_i32_0 = arith.constant 0 : i32
    %c0_i32_1 = arith.constant 0 : i32
    %c0_i32_2 = arith.constant 0 : i32
    %0 = tpu.memref_slice %arg0[%c0_i32_1, %c0_i32_2] : memref<16x512xf32, #tpu.memory_space<any>> -> memref<16x512xf32, #tpu.memory_space<any>>
    %c0_i32_3 = arith.constant 0 : i32
    %c0_i32_4 = arith.constant 0 : i32
    %1 = tpu.memref_slice %arg1[%c0_i32, %c0_i32_3, %c0_i32_4] : memref<1x16x512xf32, #tpu.memory_space<any>> -> memref<1x16x512xf32, #tpu.memory_space<any>>
    %2 = tpu.memref_squeeze %1 : memref<1x16x512xf32, #tpu.memory_space<any>> -> memref<16x512xf32, #tpu.memory_space<any>>
    %3 = tpu.memref_slice %arg2[%c0_i32_0] : memref<1x!tpu.dma_semaphore, #tpu.memory_space<semaphore_mem>> -> memref<1x!tpu.dma_semaphore, #tpu.memory_space<semaphore_mem>>
    %4 = tpu.memref_squeeze %3 : memref<1x!tpu.dma_semaphore, #tpu.memory_space<semaphore_mem>> -> memref<!tpu.dma_semaphore, #tpu.memory_space<semaphore_mem>>
    tpu.enqueue_dma source(%0 : memref<16x512xf32, #tpu.memory_space<any>>) target(%2 : memref<16x512xf32, #tpu.memory_space<any>>) target_semaphore(%4 : memref<!tpu.dma_semaphore, #tpu.memory_space<semaphore_mem>>)
    %c0_i32_5 = arith.constant 0 : i32
    %c0_i32_6 = arith.constant 0 : i32
    %c0_i32_7 = arith.constant 0 : i32
    %c0_i32_8 = arith.constant 0 : i32
    %5 = tpu.memref_slice %arg0[%c0_i32_7, %c0_i32_8] : memref<16x512xf32, #tpu.memory_space<any>> -> memref<16x512xf32, #tpu.memory_space<any>>
    %c0_i32_9 = arith.constant 0 : i32
    %c0_i32_10 = arith.constant 0 : i32
    %6 = tpu.memref_slice %arg1[%c0_i32_5, %c0_i32_9, %c0_i32_10] : memref<1x16x512xf32, #tpu.memory_space<any>> -> memref<1x16x512xf32, #tpu.memory_space<any>>
    %7 = tpu.memref_squeeze %6 : memref<1x16x512xf32, #tpu.memory_space<any>> -> memref<16x512xf32, #tpu.memory_space<any>>
    %8 = tpu.memref_slice %arg2[%c0_i32_6] : memref<1x!tpu.dma_semaphore, #tpu.memory_space<semaphore_mem>> -> memref<1x!tpu.dma_semaphore, #tpu.memory_space<semaphore_mem>>
    %9 = tpu.memref_squeeze %8 : memref<1x!tpu.dma_semaphore, #tpu.memory_space<semaphore_mem>> -> memref<!tpu.dma_semaphore, #tpu.memory_space<semaphore_mem>>
    tpu.wait_dma2 semaphore(%9 : memref<!tpu.dma_semaphore, #tpu.memory_space<semaphore_mem>>) src(%5 : memref<16x512xf32, #tpu.memory_space<any>>) dst(%7 : memref<16x512xf32, #tpu.memory_space<any>>)
    return
  }
}

</mosaic_0001>

<bundles_post_ra>
// kernel: tpu_custom_call.1
= control target key start
LH: loop header
LB: loop body
LE: loop exit
PB: predicated region body
PF: predicated region fallthrough
CT: control target
= control target key end

     0   :  { %s29_s6 = smov [#allocation2]   ;;  %s30_s7 = smov 131072   ;;  %s48_s0 = inlined_call_operand.hbm [shape: f32[16,512], index: 0, kind: input, shape index: {}]   ;;  %s49_s1 = inlined_call_operand.hbm [shape: f32[1,16,512], index: 1, kind: output, shape index: {}]  }
   0x1   :  { %s31_s8 = smov 0  }
   0x2   :  { %12 = dma.general %s48_s0, 1024, %s49_s1, %s29_s6, %s30_s7, [#allocation4], %s31_s8, 0  }
   0x3   :  { %27 = dma.done.wait [#allocation2], 1024 }
   0x4   :  { %28 = vsyncadd [#allocation2], 4294966272 }
   0x5   :  { %17 = vsyncmov [#allocation2] }
   0x8   :  { %s18_s13 = vpop.sfrf %17 }
   0x9   :  { %p23_p0 = scmp.ne.s32.totalorder %s18_s13, 0 }
   0xb   :  { %22 = shalt.err (%p23_p0)  }

</bundles_post_ra>
